<compile_context>
chip_gen: v7x
topology: tpu7x:2x2x1
jax: 0.10.0
libtpu: 0.0.40
codegen_flags: <defaults>
</compile_context>

<pallas_src>
import functools

import jax
import jax.numpy as jnp
from jax.experimental import pallas as pl
from jax.experimental.pallas import tpu as pltpu


def _round_up(x, m):
    return ((x + m - 1) // m) * m


# ----------------------------------------------------------------------------
# Kernel 1: tiled linear layer  y = x @ W + b
# ----------------------------------------------------------------------------
def _linear_kernel(x_ref, w_ref, b_ref, o_ref, acc_ref):
    k = pl.program_id(2)

    @pl.when(k == 0)
    def _init():
        acc_ref[...] = jnp.zeros_like(acc_ref)

    acc_ref[...] += jnp.dot(x_ref[...], w_ref[...],
                            preferred_element_type=jnp.float32)

    @pl.when(k == pl.num_programs(2) - 1)
    def _finalize():
        # bias added exactly once, on the final K step
        o_ref[...] = (acc_ref[...] + b_ref[...].astype(jnp.float32)
                      ).astype(o_ref.dtype)


def linear(x2d, w, b, *, tm=256, tn=256, tk=256):
    """x2d: (M, K), w: (K, N), b: (N,) -> (M, N).

    K-reduction grid with a resident f32 accumulator.  Inputs are padded to
    tile multiples (zeros do not change the result) and the output is sliced
    back.  Operands keep their dtype (bf16 recommended for the MXU on
    v6e/v7x); accumulation is always f32.
    """
    M, K = x2d.shape
    K2, N = w.shape
    assert K == K2 and b.shape == (N,)
    out_dtype = x2d.dtype

    tm = min(tm, _round_up(M, 8))
    tk = min(tk, _round_up(K, 128))
    tn = min(tn, _round_up(N, 128))
    Mp, Kp, Np = _round_up(M, tm), _round_up(K, tk), _round_up(N, tn)

    xp = x2d if (Mp == M and Kp == K) else jnp.pad(x2d, ((0, Mp - M), (0, Kp - K)))
    wp = w if (Kp == K and Np == N) else jnp.pad(w, ((0, Kp - K), (0, Np - N)))
    bp = b if Np == N else jnp.pad(b, (0, Np - N))
    bp = bp.reshape(1, Np)

    grid = (Mp // tm, Np // tn, Kp // tk)
    out = pl.pallas_call(
        _linear_kernel,
        out_shape=jax.ShapeDtypeStruct((Mp, Np), out_dtype),
        grid=grid,
        in_specs=[
            pl.BlockSpec((tm, tk), lambda i, j, k: (i, k)),
            pl.BlockSpec((tk, tn), lambda i, j, k: (k, j)),
            pl.BlockSpec((1, tn), lambda i, j, k: (0, j)),
        ],
        out_specs=pl.BlockSpec((tm, tn), lambda i, j, k: (i, j)),
        scratch_shapes=[pltpu.VMEM((tm, tn), jnp.float32)],
        # NOTE: for larger tiles on v5e/v6e raise vmem_limit_bytes here; keep
        # tiles modest on v7x (64 MiB physical VMEM).
        compiler_params=pltpu.CompilerParams(
            dimension_semantics=("parallel", "parallel", "arbitrary")),
    )(xp, wp, bp)

    if (Mp, Np) != (M, N):
        out = out[:M, :N]
    return out


# ----------------------------------------------------------------------------
# Kernel 2: LayerNorm over the last dimension (row-blocked)
# ----------------------------------------------------------------------------
def _layernorm_kernel(x_ref, g_ref, b_ref, o_ref, *, eps):
    x = x_ref[...].astype(jnp.float32)
    mean = jnp.mean(x, axis=-1, keepdims=True)
    xc = x - mean
    var = jnp.mean(xc * xc, axis=-1, keepdims=True)
    inv = jax.lax.rsqrt(var + eps)
    y = xc * inv * g_ref[...].astype(jnp.float32) + b_ref[...].astype(jnp.float32)
    o_ref[...] = y.astype(o_ref.dtype)


def layernorm(x2d, gamma, beta, *, eps=1e-5, tm=512):
    M, F = x2d.shape
    tm = min(tm, _round_up(M, 8))
    Mp = _round_up(M, tm)
    xp = x2d if Mp == M else jnp.pad(x2d, ((0, Mp - M), (0, 0)))
    out = pl.pallas_call(
        functools.partial(_layernorm_kernel, eps=eps),
        out_shape=jax.ShapeDtypeStruct((Mp, F), x2d.dtype),
        grid=(Mp // tm,),
        in_specs=[
            pl.BlockSpec((tm, F), lambda i: (i, 0)),
            pl.BlockSpec((1, F), lambda i: (0, 0)),
            pl.BlockSpec((1, F), lambda i: (0, 0)),
        ],
        out_specs=pl.BlockSpec((tm, F), lambda i: (i, 0)),
        compiler_params=pltpu.CompilerParams(dimension_semantics=("parallel",)),
    )(xp, gamma.reshape(1, F), beta.reshape(1, F))
    return out if Mp == M else out[:M]


# ----------------------------------------------------------------------------
# Kernel 3: multi-head attention, grid over (batch, head-group)
# ----------------------------------------------------------------------------
def _attn_kernel(q_ref, k_ref, v_ref, o_ref, *, heads_per_block, head_dim,
                 inv_scale):
    q = q_ref[...]          # (N, g*d)
    k = k_ref[...]
    v = v_ref[...]
    outs = []
    for h in range(heads_per_block):
        sl = slice(h * head_dim, (h + 1) * head_dim)
        qh = q[:, sl] * inv_scale          # fold 1/sqrt(emb) into q (N, d)
        kh = k[:, sl]
        vh = v[:, sl]
        # energy = qh @ kh^T without an explicit transpose (contract last dims)
        energy = jax.lax.dot_general(
            qh, kh, dimension_numbers=(((1,), (1,)), ((), ())),
            preferred_element_type=jnp.float32)              # (N, N) f32
        m = jnp.max(energy, axis=-1, keepdims=True)
        p = jnp.exp(energy - m)
        denom = jnp.sum(p, axis=-1, keepdims=True)
        att = p * pl.reciprocal(denom, approx=True)          # EUP reciprocal
        outs.append(jnp.dot(att.astype(vh.dtype), vh,
                            preferred_element_type=jnp.float32))  # (N, d) f32
    out = outs[0] if heads_per_block == 1 else jnp.concatenate(outs, axis=-1)
    # single lane-dense store of the whole head-group, already in 'b n (h d)'
    o_ref[...] = out.astype(o_ref.dtype)


def _pick_head_group(num_heads, head_dim):
    # smallest head group whose lane width is a multiple of 128; otherwise
    # process all heads at once (block then spans the full E = full last dim).
    for g in range(1, num_heads + 1):
        if num_heads % g == 0 and (g * head_dim) % 128 == 0:
            return g
    return num_heads


def attention(q, k, v, *, num_heads, inv_scale):
    """q, k, v: (B, N, E) with per-head columns contiguous -> (B, N, E)."""
    B, N, E = q.shape
    head_dim = E // num_heads
    g = _pick_head_group(num_heads, head_dim)
    gd = g * head_dim
    spec = pl.BlockSpec((pl.Squeezed(), N, gd), lambda b, hg: (b, 0, hg))
    kernel = functools.partial(_attn_kernel, heads_per_block=g,
                               head_dim=head_dim, inv_scale=inv_scale)
    return pl.pallas_call(
        kernel,
        out_shape=jax.ShapeDtypeStruct((B, N, E), q.dtype),
        grid=(B, num_heads // g),
        in_specs=[spec, spec, spec],
        out_specs=spec,
        compiler_params=pltpu.CompilerParams(
            dimension_semantics=("parallel", "parallel")),
    )(q, k, v)


# ----------------------------------------------------------------------------
# Model forward (matches the PyTorch module; dropout = identity)
# ----------------------------------------------------------------------------
def multi_head_attention(x, p, *, num_heads):
    B, N, E = x.shape
    qkv = linear(x.reshape(B * N, E), p["w_qkv"], p["b_qkv"]).reshape(B, N, 3 * E)
    # qkv weight columns are laid out [Q | K | V] with heads contiguous inside
    # each segment, so splitting is three contiguous last-dim slices and the
    # attention kernel picks up per-head blocks via its BlockSpec index_map
    # (no (3, B, H, N, d) transpose materialized).
    q, k, v = qkv[..., :E], qkv[..., E:2 * E], qkv[..., 2 * E:]
    inv_scale = 1.0 / float(E) ** 0.5        # module scales by sqrt(emb_size)
    out = attention(q, k, v, num_heads=num_heads, inv_scale=inv_scale)
    out = linear(out.reshape(B * N, E), p["w_proj"], p["b_proj"])
    return out.reshape(B, N, E)


def transformer_block(x, p, *, num_heads):
    B, N, E = x.shape
    h = layernorm(x.reshape(B * N, E), p["att_norm_g"],
                  p["att_norm_b"]).reshape(B, N, E)
    x = x + multi_head_attention(h, p, num_heads=num_heads)

    h2 = layernorm(x.reshape(B * N, E), p["ff_norm_g"], p["ff_norm_b"])
    f = linear(h2, p["w_ff1"], p["b_ff1"])
    f = jax.nn.gelu(f, approximate=False)    # exact GELU, matches nn.GELU()
    # TODO(synk): GELU could be fused into the first FF linear's finalize step.
    f = linear(f, p["w_ff2"], p["b_ff2"])
    return x + f.reshape(B, N, E)


def patch_embed(x, p, *, patch_size):
    B, C, H, W = x.shape
    ph, pw = H // patch_size, W // patch_size
    # einops: 'b c (h p1) (w p2) -> b (h w) (p1 p2 c)'  (pure data-movement glue)
    xp = x.reshape(B, C, ph, patch_size, pw, patch_size)
    xp = jnp.transpose(xp, (0, 2, 4, 3, 5, 1)).reshape(
        B, ph * pw, patch_size * patch_size * C)
    M, D = B * ph * pw, xp.shape[-1]
    h = layernorm(xp.reshape(M, D), p["ln1_g"], p["ln1_b"])
    h = linear(h, p["w"], p["b"])
    E = p["w"].shape[1]
    h = layernorm(h, p["ln2_g"], p["ln2_b"]).reshape(B, ph * pw, E)
    cls = jnp.broadcast_to(p["cls_token"].astype(h.dtype), (B, 1, E))
    h = jnp.concatenate([cls, h], axis=1)
    h = h + p["positions"].astype(h.dtype)
    # TODO(synk): dropout(p=0.001) omitted (identity in the inference path).
    return h


def vit_forward(x, params, *, patch_size, num_heads):
    h = patch_embed(x, params["patch"], patch_size=patch_size)
    for blk in params["blocks"]:
        h = transformer_block(h, blk, num_heads=num_heads)
    B, N, E = h.shape
    h = layernorm(h.reshape(B * N, E), params["norm_g"],
                  params["norm_b"]).reshape(B, N, E)
    cls = h[:, 0]                                  # (B, E)
    return linear(cls, params["fc_w"], params["fc_b"])


# ----------------------------------------------------------------------------
# Parameters
# ----------------------------------------------------------------------------
def init_params(key, *, in_channels, patch_size, emb_size, img_size, depth,
                expansion, n_classes):
    patch_dim = in_channels * patch_size ** 2
    num_patches = (img_size // patch_size) ** 2
    keys = iter(jax.random.split(key, 8 * depth + 12))

    def dense(fan_in, shape):
        return jax.random.normal(next(keys), shape, jnp.float32) / (fan_in ** 0.5)

    def bias(shape):
        return jax.random.normal(next(keys), shape, jnp.float32) * 0.02

    patch = {
        "ln1_g": jnp.ones((patch_dim,), jnp.float32),
        "ln1_b": jnp.zeros((patch_dim,), jnp.float32),
        "w": dense(patch_dim, (patch_dim, emb_size)),
        "b": bias((emb_size,)),
        "ln2_g": jnp.ones((emb_size,), jnp.float32),
        "ln2_b": jnp.zeros((emb_size,), jnp.float32),
        "cls_token": jax.random.normal(next(keys), (emb_size,), jnp.float32) * 0.02,
        "positions": jax.random.normal(next(keys), (1, num_patches + 1, emb_size),
                                       jnp.float32) * 0.02,
    }
    blocks = []
    for _ in range(depth):
        blocks.append({
            "att_norm_g": jnp.ones((emb_size,), jnp.float32),
            "att_norm_b": jnp.zeros((emb_size,), jnp.float32),
            # qkv columns reordered at init: [Q | K | V], heads contiguous
            # inside each segment (vs. PyTorch's interleaved '(h d qkv)').
            # A pure relabeling of the random projection; lets the attention
            # kernel index per-head blocks directly via BlockSpecs.
            "w_qkv": dense(emb_size, (emb_size, 3 * emb_size)),
            "b_qkv": bias((3 * emb_size,)),
            "w_proj": dense(emb_size, (emb_size, emb_size)),
            "b_proj": bias((emb_size,)),
            "ff_norm_g": jnp.ones((emb_size,), jnp.float32),
            "ff_norm_b": jnp.zeros((emb_size,), jnp.float32),
            "w_ff1": dense(emb_size, (emb_size, expansion * emb_size)),
            "b_ff1": bias((expansion * emb_size,)),
            "w_ff2": dense(expansion * emb_size, (expansion * emb_size, emb_size)),
            "b_ff2": bias((emb_size,)),
        })
    return {
        "patch": patch,
        "blocks": blocks,
        "norm_g": jnp.ones((emb_size,), jnp.float32),
        "norm_b": jnp.zeros((emb_size,), jnp.float32),
        "fc_w": dense(emb_size, (emb_size, n_classes)),
        "fc_b": bias((n_classes,)),
    }


# ----------------------------------------------------------------------------
# Pure-JAX reference (same math / same parameter layout)
# ----------------------------------------------------------------------------
def ref_vit(x, params, *, patch_size, num_heads):
    def ln(t, g, b, eps=1e-5):
        m = t.mean(-1, keepdims=True)
        v = ((t - m) ** 2).mean(-1, keepdims=True)
        return (t - m) * jax.lax.rsqrt(v + eps) * g + b

    p = params["patch"]
    B, C, H, W = x.shape
    ph = H // patch_size
    xp = x.reshape(B, C, ph, patch_size, ph, patch_size)
    xp = jnp.transpose(xp, (0, 2, 4, 3, 5, 1)).reshape(B, ph * ph, -1)
    h = ln(xp, p["ln1_g"], p["ln1_b"])
    h = h @ p["w"] + p["b"]
    h = ln(h, p["ln2_g"], p["ln2_b"])
    E = h.shape[-1]
    cls = jnp.broadcast_to(p["cls_token"], (B, 1, E))
    h = jnp.concatenate([cls, h], axis=1) + p["positions"]
    d = E // num_heads
    for blk in params["blocks"]:
        a = ln(h, blk["att_norm_g"], blk["att_norm_b"])
        qkv = a @ blk["w_qkv"] + blk["b_qkv"]
        q, k, v = jnp.split(qkv, 3, axis=-1)
        sh = lambda t: t.reshape(B, -1, num_heads, d).transpose(0, 2, 1, 3)
        q, k, v = sh(q), sh(k), sh(v)
        energy = jnp.einsum("bhqd,bhkd->bhqk", q, k)
        att = jax.nn.softmax(energy / (E ** 0.5), axis=-1)
        o = jnp.einsum("bhqk,bhkd->bhqd", att, v)
        o = o.transpose(0, 2, 1, 3).reshape(B, -1, E)
        h = h + (o @ blk["w_proj"] + blk["b_proj"])
        f = ln(h, blk["ff_norm_g"], blk["ff_norm_b"])
        f = jax.nn.gelu(f @ blk["w_ff1"] + blk["b_ff1"], approximate=False)
        h = h + (f @ blk["w_ff2"] + blk["b_ff2"])
    h = ln(h, params["norm_g"], params["norm_b"])
    return h[:, 0] @ params["fc_w"] + params["fc_b"]


if __name__ == "__main__":
    in_channels, patch_size, img_size = 3, 4, 16
    emb_size, num_heads, depth, expansion, n_classes = 32, 4, 2, 4, 10
    B = 2

    key = jax.random.PRNGKey(0)
    kx, kp, k1, k2, k3 = jax.random.split(key, 5)

    # ---- unit test of the tiled linear kernel with a multi-block grid -------
    xa = jax.random.normal(k1, (72, 320), jnp.float32)
    wa = jax.random.normal(k2, (320, 192), jnp.float32) * 0.1
    ba = jax.random.normal(k3, (192,), jnp.float32)
    ya = linear(xa, wa, ba, tm=32, tn=128, tk=128)     # grid (3, 2, 3)
    ya = jax.block_until_ready(ya)
    assert jnp.allclose(ya, xa @ wa + ba, atol=1e-3, rtol=1e-3)

    # ---- full ViT forward ----------------------------------------------------
    x = jax.random.normal(kx, (B, in_channels, img_size, img_size), jnp.float32)
    params = init_params(kp, in_channels=in_channels, patch_size=patch_size,
                         emb_size=emb_size, img_size=img_size, depth=depth,
                         expansion=expansion, n_classes=n_classes)

    vit_fwd = jax.jit(functools.partial(vit_forward, patch_size=patch_size,
                                        num_heads=num_heads))
    logits = jax.block_until_ready(vit_fwd(x, params))
    assert logits.shape == (B, n_classes)

    ref = ref_vit(x, params, patch_size=patch_size, num_heads=num_heads)
    assert jnp.allclose(logits, ref, atol=3e-2, rtol=3e-2), \
        float(jnp.max(jnp.abs(logits - ref)))

    # bf16 MXU operands (f32 accumulation stays inside the kernels) smoke test
    to_bf16 = lambda t: jax.tree_util.tree_map(
        lambda a: a.astype(jnp.bfloat16), t)
    logits_bf16 = jax.block_until_ready(
        vit_fwd(x.astype(jnp.bfloat16), to_bf16(params)))
    assert logits_bf16.shape == (B, n_classes)
    assert bool(jnp.all(jnp.isfinite(logits_bf16.astype(jnp.float32))))

    print("KERNEL_OK")
</pallas_src>

<mosaic_0001>
module attributes {stable_mosaic.version = 11 : i64} {
  func.func @_linear_kernel(%arg0: i32, %arg1: i32, %arg2: i32, %arg3: memref<32x128xf32, #tpu.memory_space<vmem>>, %arg4: memref<128x128xf32, #tpu.memory_space<vmem>>, %arg5: memref<1x128xf32, #tpu.memory_space<vmem>>, %arg6: memref<32x128xf32, #tpu.memory_space<vmem>>, %arg7: memref<32x128xf32, #tpu.memory_space<vmem>>) attributes {dimension_semantics = [#tpu.dimension_semantics<parallel>, #tpu.dimension_semantics<parallel>, #tpu.dimension_semantics<arbitrary>], iteration_bounds = array<i64: 3, 2, 3>, scalar_prefetch = 0 : i64, scratch_operands = 1 : i64, tpu.core_type = #tpu.core_type<tc>, window_params = [{transform_indices = @transform_0, window_bounds = array<i64: 32, 128>}, {transform_indices = @transform_1, window_bounds = array<i64: 128, 128>}, {transform_indices = @transform_2, window_bounds = array<i64: 1, 128>}, {transform_indices = @transform_3, window_bounds = array<i64: 32, 128>}]} {
    %c0_i32 = arith.constant 0 : i32
    %0 = arith.cmpi eq, %arg2, %c0_i32 : i32
    %1 = arith.extui %0 : i1 to i32
    %c0_i32_0 = arith.constant 0 : i32
    %2 = arith.cmpi ne, %1, %c0_i32_0 : i32
    scf.if %2 {
      %cst_9 = arith.constant 0.000000e+00 : f32
      %12 = vector.broadcast %cst_9 : f32 to vector<32x128xf32>
      %c0_10 = arith.constant 0 : index
      %c0_11 = arith.constant 0 : index
      %13 = vector.load %arg7[%c0_10, %c0_11] : memref<32x128xf32, #tpu.memory_space<vmem>>, vector<32x128xf32>
      tpu.vector_store %arg7[%c0_10, %c0_11], %12 {strides = array<i32>} : memref<32x128xf32, #tpu.memory_space<vmem>>, vector<32x128xf32>,
    } else {
    }
    %c0 = arith.constant 0 : index
    %c0_1 = arith.constant 0 : index
    %3 = vector.load %arg7[%c0, %c0_1] : memref<32x128xf32, #tpu.memory_space<vmem>>, vector<32x128xf32>
    %c0_2 = arith.constant 0 : index
    %c0_3 = arith.constant 0 : index
    %4 = vector.load %arg3[%c0_2, %c0_3] : memref<32x128xf32, #tpu.memory_space<vmem>>, vector<32x128xf32>
    %c0_4 = arith.constant 0 : index
    %c0_5 = arith.constant 0 : index
    %5 = vector.load %arg4[%c0_4, %c0_5] : memref<128x128xf32, #tpu.memory_space<vmem>>, vector<128x128xf32>
    %cst = arith.constant dense<0.000000e+00> : vector<32x128xf32>
    %6 = tpu.matmul %4, %5, %cst {dimension_numbers = #tpu.dot_dimension_numbers<[1], [0], [0], [1], [0, 0, 1, 1], [], []>} : vector<32x128xf32>, vector<128x128xf32>, vector<32x128xf32> -> vector<32x128xf32>
    %7 = arith.addf %3, %6 : vector<32x128xf32>
    %c0_6 = arith.constant 0 : index
    %c0_7 = arith.constant 0 : index
    %8 = vector.load %arg7[%c0_6, %c0_7] : memref<32x128xf32, #tpu.memory_space<vmem>>, vector<32x128xf32>
    tpu.vector_store %arg7[%c0_6, %c0_7], %7 {strides = array<i32>} : memref<32x128xf32, #tpu.memory_space<vmem>>, vector<32x128xf32>,
    %c2_i32 = arith.constant 2 : i32
    %9 = arith.cmpi eq, %arg2, %c2_i32 : i32
    %10 = arith.extui %9 : i1 to i32
    %c0_i32_8 = arith.constant 0 : i32
    %11 = arith.cmpi ne, %10, %c0_i32_8 : i32
    scf.if %11 {
      %c0_9 = arith.constant 0 : index
      %c0_10 = arith.constant 0 : index
      %12 = vector.load %arg7[%c0_9, %c0_10] : memref<32x128xf32, #tpu.memory_space<vmem>>, vector<32x128xf32>
      %c0_11 = arith.constant 0 : index
      %c0_12 = arith.constant 0 : index
      %13 = vector.load %arg5[%c0_11, %c0_12] : memref<1x128xf32, #tpu.memory_space<vmem>>, vector<1x128xf32>
      %14 = vector.broadcast %13 : vector<1x128xf32> to vector<32x128xf32>
      %15 = arith.addf %12, %14 : vector<32x128xf32>
      %c0_13 = arith.constant 0 : index
      %c0_14 = arith.constant 0 : index
      %16 = vector.load %arg6[%c0_13, %c0_14] : memref<32x128xf32, #tpu.memory_space<vmem>>, vector<32x128xf32>
      tpu.vector_store %arg6[%c0_13, %c0_14], %15 {strides = array<i32>} : memref<32x128xf32, #tpu.memory_space<vmem>>, vector<32x128xf32>,
    } else {
    }
    return
  }
  func.func @transform_0(%arg0: i32, %arg1: i32, %arg2: i32) -> (i32, i32) {
    %c0_i32 = arith.constant 0 : i32
    return %arg0, %arg2 : i32, i32
  }
  func.func @transform_1(%arg0: i32, %arg1: i32, %arg2: i32) -> (i32, i32) {
    %c0_i32 = arith.constant 0 : i32
    return %arg2, %arg1 : i32, i32
  }
  func.func @transform_2(%arg0: i32, %arg1: i32, %arg2: i32) -> (i32, i32) {
    %c0_i32 = arith.constant 0 : i32
    %c0_i32_0 = arith.constant 0 : i32
    return %c0_i32, %arg1 : i32, i32
  }
  func.func @transform_3(%arg0: i32, %arg1: i32, %arg2: i32) -> (i32, i32) {
    %c0_i32 = arith.constant 0 : i32
    return %arg0, %arg1 : i32, i32
  }
}

</mosaic_0001>

<bundles_post_ra>
// kernel: tpu_custom_call.1
= control target key start
LH: loop header
LB: loop body
LE: loop exit
PB: predicated region body
PF: predicated region fallthrough
CT: control target
= control target key end

     0   :  { %s1545_s0 = inlined_call_operand.hbm [shape: f32[96,384], index: 0, kind: input, shape index: {}]   ;;  %s1546_s1 = inlined_call_operand.hbm [shape: f32[384,256], index: 1, kind: input, shape index: {}]   ;;  %s1547_s2 = inlined_call_operand.vmem [shape: f32[1,256], index: 2, kind: input, shape index: {}]   ;;  %s1548_s3 = inlined_call_operand.hbm [shape: f32[96,256], index: 3, kind: output, shape index: {}]  }
   0x1   :  { %1565 = sst [smem:[#allocation21_spill]] %s1545_s0 }
   0x2   :  { %1566 = sst [smem:[#allocation22_spill]] %s1547_s2 }
   0x3   :  { %1567 = sst [smem:[#allocation23_spill]] %s1548_s3 }
   0x4   :  { %8 = vsyncpa [#allocation4], 0 }
   0x5   :  { %10 = vsyncpa [#allocation4 + $0x1], 0 }
   0x6   :  { %11 = vsyncpa [#allocation7], 0 }
   0x7   :  { %13 = vsyncpa [#allocation7 + $0x1], 0 }
   0x8   :  { %14 = vsyncpa [#allocation5], 0 }
   0x9   :  { %16 = vsyncpa [#allocation5 + $0x1], 0  ;;  %s1115_s12 = smov 0   ;;  %s1117_s13 = smov 0  }
   0xa   :  { %s1119_s14 = smov 0   ;;  %s1121_s15 = smov 0  }
   0xb   :  { %s1123_s16 = smov 0   ;;  %s1125_s17 = smov 0  }
   0xc   :  { %s1127_s18 = smov 0   ;;  %s1129_s19 = smov 0  }
   0xd   :  { %s1131_s20 = smov 0   ;;  %s1133_s21 = smov 0  }
   0xe   :  { %s1135_s22 = smov 0   ;;  %s1137_s23 = smov 0  }
   0xf   :  { %s1139_s24 = smov 0   ;;  %s1141_s25 = smov 0  }
  0x10   :  { %s1143_s26 = smov 0   ;;  %s1145_s27 = smov 0  }
  0x11 LB: > { %1568 = sst [smem:[#allocation12_spill]] %s1058_s21  ;;  %s567_s28 = sadd.s32 4294967295, %s1082_s27   ;;  %s1082_s27 = sphi %s1145_s27, %s22_s27   ;;  %s1078_s26 = sphi %s1143_s26, %s1615_s26   ;;  %s1074_s25 = sphi %s1141_s25, %s1628_s25   ;;  %s1070_s24 = sphi %s1139_s24, %s1627_s24   ;;  %s1066_s23 = sphi %s1137_s23, %s1612_s23   ;;  %s1062_s22 = sphi %s1135_s22, %s1626_s22   ;;  %s1058_s21 = sphi %s1133_s21, %s1625_s21   ;;  %s1054_s20 = sphi %s1131_s20, %s1624_s20   ;;  %s1050_s19 = sphi %s1129_s19, %s1623_s19   ;;  %s1046_s18 = sphi %s1127_s18, %s1622_s18   ;;  %s1042_s17 = sphi %s1125_s17, %s1621_s17   ;;  %s1038_s16 = sphi %s1123_s16, %s1620_s16   ;;  %s1034_s15 = sphi %s1121_s15, %s1619_s15   ;;  %s1030_s14 = sphi %s1119_s14, %s1618_s14   ;;  %s1026_s13 = sphi %s1117_s13, %s1617_s13   ;;  %s1022_s12 = sphi %s1115_s12, %s1616_s12  }
  0x12   : > { %1569 = sst [smem:[#allocation13_spill]] %s1062_s22  ;;  %s34_s29 = sadd.s32 1, %s1070_s24 }
  0x13   : > { %1570 = sst [smem:[#allocation14_spill]] %s1066_s23  ;;  %p1195_p0 = scmp.ge.s32.totalorder %s34_s29, 3 }
  0x14   : > { %1571 = sst [smem:[#allocation15_spill]] %s1078_s26  ;;  %p57_p1 = scmp.ne.s32.totalorder %s1054_s20, %s1050_s19 }
  0x15   : > { %s1630_s29 = smov (%p1195_p0, %s34_s29), 0  ;;  %p1552_p2 = scmp.eq.s32.totalorder %s1082_s27, 0 }
  0x16   : > { %1573 = sst [smem:[#allocation16_spill]] %s1630_s29  ;;  %p63_p3 = scmp.ne.s32.totalorder %s1050_s19, %s1046_s18 }
  0x17   : > { %s1211_s6 = ssub.s32 %s1070_s24, %s1630_s29  ;;  %p1213_p4 = scmp.eq.s32.totalorder %s567_s28, 0 }
  0x18   : > { %p59_p5 = por %p1552_p2, %p57_p1  ;;  %p1219_p6 = scmp.eq.s32.totalorder %s567_s28, 17 }
  0x19   : > { %s1574_s7 = scalar_select %p1213_p4, 1, 0 }
  0x1a   : > { %s1575_s8 = scalar_select %p1219_p6, 1, 0 }
  0x1b   : > { %p1225_p7 = por %p1213_p4, %p63_p3  ;;  %p1551_p8 = scmp.lt.s32.totalorder %s1082_s27, 18 }
  0x1c   : > { %s169_s10 = sand.u32 1, %s1054_s20   ;;  %s700_s18 = smul.u32 12, %s1078_s26 }
  0x1d   : > { %s1576_s9 = scalar_select %p1225_p7, 1, 0 }
  0x1e   : > { %s571_s11 = sshll.u32 %s169_s10, 5  ;;  %p1234_p9 = pnand %p1551_p8, %p59_p5 }
  0x1f   : > { %s173_s5 = scalar_lea.vmem [#allocation3], %s571_s11  ;;  %s179_s28 = sadd.s32 %s1070_s24, %s700_s18 }
  0x20   : > { %s182_s4 = sshll.u32 %s173_s5, 4  ;;  %s574_s3 = sshll.u32 %s179_s28, 7  ;;  %s1239_s4 = int_to_ptr.vmem [resolvable:$true] %s182_s4 }
  0x21   : > { %s1578_s0 = sld [smem:[#allocation21_spill]]  ;;  %s1246_s5 = scalar_lea.sflag [#allocation4], %s169_s10 }
  0x22   : > { %p858_p11 = pneg %p1234_p9 }
  0x27   : > { %s1244_s2 = scalar_lea.hbm %s1578_s0, %s574_s3  ;;  %s861_s21 = scalar_lea.hbm %s1578_s0, 4608 }
  0x28   : > { %s856_s11 = scalar_lea.hbm %s1244_s2, 512  ;;  %p862_p1 = scmp.lt.u32.totalorder %s1244_s2, %s1578_s0 }
  0x29   : > { %p857_p10 = scmp.ne.s32.totalorder %s1244_s2, %s856_s11  ;;  %p863_p3 = scmp.lt.u32.totalorder %s861_s21, %s856_s11 }
  0x2a   : > { %p865_p8 = scmp.lt.u32.totalorder %s856_s11, %s1244_s2 }
  0x2b   : > { %p859_p12 = pnand %p858_p11, %p857_p10  ;;  %p864_p5 = por %p863_p3, %p862_p1 }
  0x2d   : > { %p860_p13 = pneg %p859_p12  ;;  %p866_p2 = por %p865_p8, %p864_p5 }
  0x2f   : > { %p867_p7 = pnand %p866_p2, %p860_p13 }
  0x31   : > { %870 = shalt.err (!%p867_p7)
}
  0x32   : > { %s871_s10 = scalar_lea.vmem %s1239_s4, 512  ;;  %s1084_s18 = smov [#allocation3]  }
  0x33   : > { %p872_p10 = scmp.ne.s32.totalorder %s1239_s4, %s871_s10  ;;  %s876_s28 = sshll.u32 %s1084_s18, 4  ;;  %s877_s28 = int_to_ptr.vmem [resolvable:$false] %s876_s28 }
  0x34   : > { %s878_s3 = scalar_lea.vmem %s877_s28, 1024  ;;  %p879_p4 = scmp.lt.s32.totalorder %s1239_s4, %s877_s28 }
  0x35   : > { %p874_p12 = pnand %p872_p10, %p858_p11  ;;  %p880_p1 = scmp.lt.s32.totalorder %s878_s3, %s871_s10 }
  0x37   : > { %p875_p6 = pneg %p874_p12  ;;  %p881_p3 = por %p880_p1, %p879_p4 }
  0x39   : > { %p882_p8 = pnand %p881_p3, %p875_p6 }
  0x3b   : > { %885 = shalt.err (!%p882_p8)
}
  0x3c   : > { %s1085_s11 = smov 384   ;;  %s1555_s21 = smov 128  }
  0x3d   : > { %s1556_s23 = smov 8   ;;  %p579_p2 = scmp.ge.s32.totalorder %s1082_s27, 1 }
  0x3e   : > { %710 = dma.hbm_to_vmem [thread:$0]  (!%p1234_p9), %s1244_s2, 512, %s1239_s4, %s1246_s5, %s1085_s11, %s1555_s21, %s1556_s23  }
  0x3f   : > { %p219_p4 = scmp.lt.s32.totalorder %s1082_s27, 19  ;;  %s568_s18 = sadd.s32 4294967294, %s1082_s27  }
  0x40   : > { %s37_s28 = sadd.s32 1, %s1074_s25  ;;  %s78_s3 = sadd.s32 1, %s1042_s17 }
  0x41   : > { %p1278_p6 = pnand %p579_p2, %p219_p4  ;;  %s1632_s28 = smov (!%p1195_p0, %s37_s28), %s1074_s25 }
  0x42   : > { %p85_p7 = scmp.ne.s32.totalorder %s1042_s17, %s1038_s16  ;;  %p91_p9 = scmp.ne.s32.totalorder %s1038_s16, %s1034_s15 }
  0x43   : > { %p39_p11 = scmp.ge.s32.totalorder %s1632_s28, 2  ;;  %s132_s2 = sadd.s32 1, %s1030_s14 }
  0x44   : > { %p1580_p13 = scmp.eq.s32.totalorder %s1082_s27, 0  ;;  %p1582_p10 = scmp.ne.s32.totalorder %s1574_s7, 0 }
  0x45   : > { %s1634_s28 = smov (%p39_p11, %s1632_s28), 0  ;;  %s1585_s30 = sadd.s32 1, %s1078_s26 }
  0x46   : > { %p1295_p5 = por %p85_p7, %p1580_p13  ;;  %p1301_p12 = por %p91_p9, %p1582_p10 }
  0x47   : > { %1584 = sst [smem:[#allocation17_spill]] %s1634_s28  ;;  %s1636_s30 = smov (!%p39_p11, %s1585_s30), %s1078_s26 }
  0x48   : > { %s1583_s4 = scalar_select %p1301_p12, 1, 0 }
  0x49   : > { %s74_s15 = ssub.s32 %s1074_s25, %s1634_s28  ;;  %p142_p0 = scmp.ne.s32.totalorder %s1030_s14, %s1026_s13 }
  0x4a   : > { %p43_p1 = scmp.ge.s32.totalorder %s1636_s30, 3  ;;  %s75_s5 = sor.u32 %s74_s15, %s1211_s6 }
  0x4b   : > { %p76_p3 = scmp.eq.s32.totalorder %s75_s5, 0  ;;  %p1586_p8 = scmp.ne.s32.totalorder %s1575_s8, 0 }
  0x4c   : > { %s1638_s30 = smov (%p43_p1, %s1636_s30), 0  ;;  %p148_p4 = scmp.ne.s32.totalorder %s1026_s13, %s1022_s12 }
  0x4d   : > { %p1317_p2 = por %p1586_p8, %p142_p0  ;;  %1589 = sst [smem:[#allocation19_spill]] %s1638_s30 }
  0x4e   : > { %s1324_s11 = scalar_select %p76_p3, %s1042_s17, %s78_s3  }
  0x4f   : > { %s1587_s7 = scalar_select %p1317_p2, 1, 0 }
  0x50   : > { %1590 = sst [smem:[#allocation20_spill]] %s1324_s11  ;;  %s45_s21 = ssub.s32 %s1078_s26, %s1638_s30 }
  0x51   : > { %1588 = sst [smem:[#allocation18_spill]] %s1587_s7  ;;  %s47_s23 = sor.u32 %s1211_s6, %s45_s21 }
  0x52   : > { %s129_s0 = sor.u32 %s74_s15, %s45_s21  ;;  %p48_p7 = scmp.eq.s32.totalorder %s47_s23, 0 }
  0x53   : > { %p130_p9 = scmp.eq.s32.totalorder %s129_s0, 0  ;;  %p149_p11 = scmp.eq.s32.totalorder %s568_s18, 17 }
  0x54   : > { %s192_s8 = sand.u32 1, %s1042_s17   ;;  %s1591_s5 = sadd.s32 1, %s1054_s20 }
  0x55   : > { %s1335_s28 = scalar_select %p48_p7, %s1054_s20, %s1591_s5  }
  0x56   : > { %s1338_s7 = scalar_select %p130_p9, %s1030_s14, %s132_s2  }
  0x57   : > { %p1340_p13 = por %p149_p11, %p148_p4  ;;  %s575_s3 = sshll.u32 %s192_s8, 7 }
  0x58   : > { %s592_s30 = sshll.u32 %s1070_s24, 5  ;;  %s196_s21 = scalar_lea.vmem [#allocation6], %s575_s3 }
  0x59   : > { %s1592_s22 = scalar_select %p1340_p13, 1, 0 }
  0x5a   : > { %s202_s26 = sadd.s32 %s1074_s25, %s592_s30  ;;  %s205_s15 = sshll.u32 %s196_s21, 4  ;;  %s1351_s15 = int_to_ptr.vmem [resolvable:$true] %s205_s15 }
  0x5b   : > { %s578_s6 = sshll.u32 %s202_s26, 7  ;;  %p1593_p10 = scmp.lt.s32.totalorder %s1082_s27, 18 }
  0x5c   : > { %s1349_s0 = scalar_lea.hbm %s1546_s1, %s578_s6  ;;  %s1361_s26 = scalar_lea.sflag [#allocation7], %s192_s8 }
  0x5d   : > { %p1357_p0 = pnand %p1593_p10, %p1295_p5  ;;  %s886_s2 = scalar_lea.hbm %s1349_s0, 2048 }
  0x5e   : > { %p887_p1 = scmp.ne.s32.totalorder %s1349_s0, %s886_s2  ;;  %s891_s29 = scalar_lea.hbm %s1546_s1, 12288 }
  0x5f   : > { %p888_p3 = pneg %p1357_p0  ;;  %p892_p5 = scmp.lt.u32.totalorder %s1349_s0, %s1546_s1 }
  0x60   : > { %p893_p7 = scmp.lt.u32.totalorder %s891_s29, %s886_s2  ;;  %p895_p11 = scmp.lt.u32.totalorder %s886_s2, %s1349_s0 }
  0x61   : > { %p889_p8 = pnand %p888_p3, %p887_p1 }
  0x62   : > { %p894_p9 = por %p893_p7, %p892_p5 }
  0x63   : > { %p890_p4 = pneg %p889_p8 }
  0x64   : > { %p896_p10 = por %p895_p11, %p894_p9 }
  0x66   : > { %p897_p13 = pnand %p896_p10, %p890_p4 }
  0x68   : > { %900 = shalt.err (!%p897_p13)
}
  0x69   : > { %s901_s8 = scalar_lea.vmem %s1351_s15, 2048  ;;  %s1088_s6 = smov [#allocation6]  }
  0x6a   : > { %p902_p1 = scmp.ne.s32.totalorder %s1351_s15, %s901_s8  ;;  %s906_s21 = sshll.u32 %s1088_s6, 4  ;;  %s907_s21 = int_to_ptr.vmem [resolvable:$false] %s906_s21 }
  0x6b   : > { %s908_s23 = scalar_lea.vmem %s907_s21, 4096  ;;  %p909_p12 = scmp.lt.s32.totalorder %s1351_s15, %s907_s21 }
  0x6c   : > { %p904_p8 = pnand %p902_p1, %p888_p3  ;;  %p910_p5 = scmp.lt.s32.totalorder %s908_s23, %s901_s8 }
  0x6e   : > { %p905_p2 = pneg %p904_p8  ;;  %p911_p7 = por %p910_p5, %p909_p12 }
  0x70   : > { %p912_p9 = pnand %p911_p7, %p905_p2 }
  0x72   : > { %915 = shalt.err (!%p912_p9)
}
  0x73   : > { %s1089_s2 = smov 256   ;;  %s1595_s30 = smov 8  }
  0x74   : > { %s1596_s11 = smov 128   ;;  %223 = sbr.rel (%p1278_p6) target bundleno = 436 (0x1b4), region = 32 }
  0x75   : > { %713 = dma.hbm_to_vmem [thread:$0]  (!%p1357_p0), %s1349_s0, 2048, %s1351_s15, %s1361_s26, %s1089_s2, %s1596_s11, %s1595_s30  }
  0x76   : > { %s225_s29 = sand.u32 (!%p1278_p6), 1, %s1050_s19   ;;  %p1597_p12 = scmp.ne.s32.totalorder (!%p1278_p6), %s1576_s9, 0 }
  0x77   : > { %s580_s5 = sshll.u32 (!%p1278_p6), %s225_s29, 5  ;;  %s226_s3 = scalar_lea.sflag (!%p1278_p6), [#allocation4], %s225_s29 }
  0x78   : > { %s1394_s8 = scalar_lea.vmem (!%p1278_p6), [#allocation3], %s580_s5 }
  0x7b   : > { %1009 = dma.done.wait (%p1597_p12), %s226_s3, 512  }
  0x7c   : > { %1011 = vsyncadd (%p1597_p12), %s226_s3, 4294966784  ;;  %s234_s18 = sand.u32 1, %s1038_s16   ;;  %p1598_p6 = scmp.ne.s32.totalorder %s1583_s4, 0 }
  0x7d   : > { %s581_s6 = sshll.u32 %s234_s18, 7  ;;  %s235_s15 = scalar_lea.sflag [#allocation7], %s234_s18 }
  0x7e   : > { %s1401_s0 = scalar_lea.vmem [#allocation6], %s581_s6 }
  0x7f   : > { %1013 = dma.done.wait (%p1598_p6), %s235_s15, 2048  }
  0x80   : > { %1015 = vsyncadd (%p1598_p6), %s235_s15, 4294965248  ;;  %s1599_s10 = sld [smem:[#allocation13_spill]]  ;;  %s266_s26 = sand.u32 1, %s1026_s13  }
  0x81   : > { %s582_s9 = sshll.u32 %s266_s26, 5  ;;  %s1600_s2 = sld [smem:[#allocation22_spill]] }
  0x82   : > { %s1418_s11 = scalar_lea.vmem [#allocation8], %s582_s9  ;;  %s1601_s29 = sld [smem:[#allocation12_spill]] }
  0x86   : > { %p271_p2 = scmp.lt.s32.totalorder %s1599_s10, 1 }
  0x88   : > { %s1640_s10 = smov (!%p271_p2, %s1599_s10), 1  ;;  %p583_p13 = scmp.ne.s32.totalorder %s1601_s29, 0 }
  0x89   : > { %s273_s30 = scalar_lea.vmem %s1600_s2, %s1640_s10  ;;  %v1090_v0 = vmov (!%p583_p13), 0.0  }
  0x8a   : > { %278 = sbr.rel (%p583_p13) target bundleno = 145 (0x91), region = 44  ;;  %279 = vst [vmem:[#allocation2] sm:$0xff] (!%p583_p13), %v1090_v0  ;;  %280 = vst [vmem:[#allocation2 + $0x8] sm:$0xff] (!%p583_p13), %v1090_v0 }
  0x8b   : > { %281 = vst [vmem:[#allocation2 + $0x10] sm:$0xff] (!%p583_p13), %v1090_v0  ;;  %282 = vst [vmem:[#allocation2 + $0x18] sm:$0xff] (!%p583_p13), %v1090_v0 }
  0x91 PF: > { %v291_v1 = vld [vmem:[%s1401_s0] sm:$0xff]  ;;  %v292_v2 = vld [vmem:[%s1401_s0 + $0x8] sm:$0xff]  ;;  %v293_v3 = vld [vmem:[%s1401_s0 + $0x10] sm:$0xff]  ;;  %s1602_s4 = sld [smem:[#allocation12_spill]] }
  0x92   : > { %v652_v4 = vpack.c.bf16 %v292_v2, %v291_v1  ;;  %v294_v5 = vld [vmem:[%s1401_s0 + $0x18] sm:$0xff]  ;;  %v295_v7 = vld [vmem:[%s1401_s0 + $0x20] sm:$0xff]  ;;  %v296_v8 = vld [vmem:[%s1401_s0 + $0x28] sm:$0xff] }
  0x93   : > { %v656_v6 = vpack.c.bf16 %v294_v5, %v293_v3  ;;  %v660_v9 = vpack.c.bf16 %v296_v8, %v295_v7  ;;  %v287_v10 = vld [vmem:[%s1394_s8] sm:$0xff]  ;;  %v289_v11 = vld [vmem:[%s1394_s8 + $0x10] sm:$0xff]  ;;  %v298_v13 = vld [vmem:[%s1401_s0 + $0x38] sm:$0xff] }
  0x94   : > { %653 = vmatprep.subr.bf16.mxu0 %v652_v4  ;;  %684 = vmatprep.subr.bf16.mxu1 %v652_v4  ;;  %v297_v12 = vld [vmem:[%s1401_s0 + $0x30] sm:$0xff]  ;;  %v299_v15 = vld [vmem:[%s1401_s0 + $0x40] sm:$0xff]  ;;  %v300_v16 = vld [vmem:[%s1401_s0 + $0x48] sm:$0xff] }
  0x95   : > { %655 = vmatpush3.bf16.msra.mxu0 %v652_v4  ;;  %692 = vmatpush3.bf16.msra.mxu1 %v652_v4  ;;  %v664_v14 = vpack.c.bf16 %v298_v13, %v297_v12  ;;  %v668_v17 = vpack.c.bf16 %v300_v16, %v299_v15  ;;  %v301_v18 = vld [vmem:[%s1401_s0 + $0x50] sm:$0xff]  ;;  %v302_v19 = vld [vmem:[%s1401_s0 + $0x58] sm:$0xff]  ;;  %v303_v21 = vld [vmem:[%s1401_s0 + $0x60] sm:$0xff] }
  0x96   : > { %657 = vmatprep.subr.bf16.mxu0 %v656_v6  ;;  %685 = vmatprep.subr.bf16.mxu1 %v656_v6  ;;  %v672_v20 = vpack.c.bf16 %v302_v19, %v301_v18  ;;  %v304_v22 = vld [vmem:[%s1401_s0 + $0x68] sm:$0xff]  ;;  %v305_v24 = vld [vmem:[%s1401_s0 + $0x70] sm:$0xff]  ;;  %v306_v25 = vld [vmem:[%s1401_s0 + $0x78] sm:$0xff] }
  0x97   : > { %646 = vmatprep.mubr.f32.mxu0 %v287_v10  ;;  %649 = vmatprep.mubr.f32.mxu1 %v289_v11  ;;  %v676_v23 = vpack.c.bf16 %v304_v22, %v303_v21  ;;  %v680_v26 = vpack.c.bf16 %v306_v25, %v305_v24  ;;  %v288_v27 = vld [vmem:[%s1394_s8 + $0x8] sm:$0xff]  ;;  %v290_v28 = vld [vmem:[%s1394_s8 + $0x18] sm:$0xff]  ;;  %v283_v31 = vld [vmem:[#allocation2] sm:$0xff]  ;;  %p584_p0 = scmp.ne.s32.totalorder %s1602_s4, 2 }
  0x98   : > { %v284_v29 = vld [vmem:[#allocation2 + $0x8] sm:$0xff]  ;;  %v286_v30 = vld [vmem:[#allocation2 + $0x18] sm:$0xff]  ;;  %v285_v32 = vld [vmem:[#allocation2 + $0x10] sm:$0xff] }
  0x99   : > { %659 = vmatpush3.bf16.msra.mxu0 %v656_v6  ;;  %693 = vmatpush3.bf16.msra.mxu1 %v656_v6  ;;  %v585_v42 = vld [vmem:[%s273_s30] ss:$0 sm:$0xff] (!%p584_p0) }
  0x9a   : > { %661 = vmatprep.subr.bf16.mxu0 %v660_v9  ;;  %686 = vmatprep.subr.bf16.mxu1 %v660_v9 }
  0x9d   : > { %663 = vmatpush3.bf16.msra.mxu0 %v660_v9  ;;  %694 = vmatpush3.bf16.msra.mxu1 %v660_v9 }
  0x9e   : > { %665 = vmatprep.subr.bf16.mxu0 %v664_v14  ;;  %687 = vmatprep.subr.bf16.mxu1 %v664_v14 }
  0xa1   : > { %667 = vmatpush3.bf16.msra.mxu0 %v664_v14  ;;  %695 = vmatpush3.bf16.msra.mxu1 %v664_v14 }
  0xa2   : > { %669 = vmatprep.subr.bf16.mxu0 %v668_v17  ;;  %688 = vmatprep.subr.bf16.mxu1 %v668_v17 }
  0xa5   : > { %671 = vmatpush3.bf16.msra.mxu0 %v668_v17  ;;  %696 = vmatpush3.bf16.msra.mxu1 %v668_v17 }
  0xa6   : > { %673 = vmatprep.subr.bf16.mxu0 %v672_v20  ;;  %689 = vmatprep.subr.bf16.mxu1 %v672_v20 }
  0xa9   : > { %675 = vmatpush3.bf16.msra.mxu0 %v672_v20  ;;  %697 = vmatpush3.bf16.msra.mxu1 %v672_v20 }
  0xaa   : > { %677 = vmatprep.subr.bf16.mxu0 %v676_v23  ;;  %690 = vmatprep.subr.bf16.mxu1 %v676_v23 }
  0xad   : > { %679 = vmatpush3.bf16.msra.mxu0 %v676_v23  ;;  %698 = vmatpush3.bf16.msra.mxu1 %v676_v23 }
  0xae   : > { %681 = vmatprep.subr.bf16.mxu0 %v680_v26  ;;  %691 = vmatprep.subr.bf16.mxu1 %v680_v26 }
  0xb1   : > { %683 = vmatpush3.bf16.msra.mxu0 %v680_v26  ;;  %699 = vmatpush3.bf16.msra.mxu1 %v680_v26 }
  0xb4   : > { %647 = vmatmul.mubr.f32.vlgmr.msra.gmra.mrb[0].mxu0 %v288_v27  ;;  %650 = vmatmul.mubr.f32.vlgmr.msra.gmra.mrb[0].mxu1 %v290_v28 }
 0x185   : > { %403 = sbr.rel (%p584_p0) target bundleno = 406 (0x196), region = 48 }
 0x187   : > { %v648_v33 = vpop.f32.mrb[0].mxu0  ;;  %v651_v34 = vpop.f32.mrb[0].mxu1 }
 0x188   : > { %v393_v35 = vadd.f32 %v648_v33, %v284_v29  ;;  %v395_v36 = vadd.f32 %v651_v34, %v286_v30  ;;  %v373_v37 = vpop.f32.mrb[1].mxu0  ;;  %v383_v38 = vpop.f32.mrb[1].mxu1 }
 0x189   : > { %v392_v39 = vadd.f32 %v373_v37, %v283_v31  ;;  %v394_v40 = vadd.f32 %v383_v38, %v285_v32 }
 0x18a   : > { %397 = vst [vmem:[#allocation2 + $0x8] sm:$0xff] %v393_v35  ;;  %399 = vst [vmem:[#allocation2 + $0x18] sm:$0xff] %v395_v36 }
 0x18b   : > { %396 = vst [vmem:[#allocation2] sm:$0xff] %v392_v39  ;;  %398 = vst [vmem:[#allocation2 + $0x10] sm:$0xff] %v394_v40 }
 0x191   : > { %v405_v43 = vld [vmem:[#allocation2 + $0x8] sm:$0xff]  ;;  %v407_v47 = vld [vmem:[#allocation2 + $0x18] sm:$0xff] }
 0x192   : > { %v404_v41 = vld [vmem:[#allocation2] sm:$0xff]  ;;  %v416_v45 = vadd.f32 %v585_v42, %v405_v43  ;;  %v406_v46 = vld [vmem:[#allocation2 + $0x10] sm:$0xff]  ;;  %v418_v49 = vadd.f32 %v585_v42, %v407_v47 }
 0x193   : > { %v415_v44 = vadd.f32 %v585_v42, %v404_v41  ;;  %v417_v48 = vadd.f32 %v585_v42, %v406_v46 }
 0x194   : > { %420 = vst [vmem:[%s1418_s11 + $0x8] sm:$0xff] %v416_v45  ;;  %422 = vst [vmem:[%s1418_s11 + $0x18] sm:$0xff] %v418_v49 }
 0x195   : > { %419 = vst [vmem:[%s1418_s11] sm:$0xff] %v415_v44  ;;  %421 = vst [vmem:[%s1418_s11 + $0x10] sm:$0xff] %v417_v48 }
 0x196 PF: > { %s1604_s18 = sld [smem:[#allocation14_spill]]  ;;  %s1605_s6 = sld [smem:[#allocation13_spill]] }
 0x197   : > { %s1606_s15 = sld [smem:[#allocation18_spill]]  ;;  %s439_s9 = sshll.u32 %s1418_s11, 4  ;;  %s1454_s9 = int_to_ptr.vmem [resolvable:$true] %s439_s9 }
 0x198   : > { %s1607_s30 = sld [smem:[#allocation23_spill]]  ;;  %s1463_s4 = scalar_lea.sflag [#allocation5], %s266_s26 }
 0x199   : > { %s916_s5 = scalar_lea.vmem %s1454_s9, 512  ;;  %s1091_s11 = smov [#allocation8]  }
 0x19a   : > { %p917_p3 = scmp.ne.s32.totalorder %s1454_s9, %s916_s5  ;;  %s920_s3 = sshll.u32 %s1091_s11, 4  ;;  %s921_s3 = int_to_ptr.vmem [resolvable:$false] %s920_s3 }
 0x19b   : > { %s922_s8 = scalar_lea.vmem %s921_s3, 1024  ;;  %p923_p1 = scmp.lt.s32.totalorder %s1454_s9, %s921_s3 }
 0x19c   : > { %s593_s0 = sshll.u32 %s1604_s18, 3  ;;  %p924_p8 = scmp.lt.s32.totalorder %s922_s8, %s916_s5 }
 0x19d   : > { %s436_s10 = sadd.s32 %s1605_s6, %s593_s0  ;;  %p1608_p4 = scmp.ne.s32.totalorder %s1606_s15, 0 }
 0x19e   : > { %s589_s21 = sshll.u32 %s436_s10, 7  ;;  %p925_p5 = por %p924_p8, %p923_p1 }
 0x19f   : > { %s1459_s29 = scalar_lea.hbm %s1607_s30, %s589_s21  ;;  %p918_p11 = pnand %p917_p3, %p1608_p4 }
 0x1a1   : > { %p919_p10 = pneg %p918_p11 }
 0x1a3   : > { %p926_p7 = pnand %p925_p5, %p919_p10 }
 0x1a5   : > { %929 = shalt.err (!%p926_p7)
}
 0x1a6   : > { %s930_s26 = scalar_lea.hbm %s1459_s29, 512  ;;  %s934_s0 = scalar_lea.hbm %s1607_s30, 3072 }
 0x1a7   : > { %p931_p9 = scmp.ne.s32.totalorder %s1459_s29, %s930_s26  ;;  %p935_p2 = scmp.lt.u32.totalorder %s1459_s29, %s1607_s30 }
 0x1a8   : > { %p936_p13 = scmp.lt.u32.totalorder %s934_s0, %s930_s26  ;;  %p938_p3 = scmp.lt.u32.totalorder %s930_s26, %s1459_s29 }
 0x1a9   : > { %p932_p12 = pnand %p931_p9, %p1608_p4 }
 0x1aa   : > { %p937_p0 = por %p936_p13, %p935_p2 }
 0x1ab   : > { %p933_p6 = pneg %p932_p12 }
 0x1ac   : > { %p939_p11 = por %p938_p3, %p937_p0 }
 0x1ae   : > { %p940_p10 = pnand %p939_p11, %p933_p6 }
 0x1b0   : > { %943 = shalt.err (!%p940_p10)
}
 0x1b1   : > { %s1092_s23 = smov 128   ;;  %s1093_s2 = smov 256  }
 0x1b2   : > { %s1094_s5 = smov 8  }
 0x1b3   : > { %705 = dma.vmem_to_hbm [thread:$0]  (%p1608_p4), %s1454_s9, 512, %s1459_s29, %s1463_s4, %s1092_s23, %s1093_s2, %s1094_s5  }
 0x1b4 PF: > { %p719_p1 = scmp.ge.s32.totalorder %s1082_s27, 2  ;;  %s454_s11 = sand.u32 1, %s1022_s12  }
 0x1b5   : > { %p1609_p8 = scmp.ne.s32.totalorder %s1592_s22, 0  ;;  %s455_s3 = scalar_lea.sflag [#allocation5], %s454_s11 }
 0x1b7   : > { %p715_p5 = pnand %p719_p1, %p1609_p8 }
 0x1b9   : > { %1017 = dma.done.wait (!%p715_p5), %s455_s3, 512  }
 0x1ba   : > { %1019 = vsyncadd (!%p715_p5), %s455_s3, 4294966784  ;;  %s22_s27 = sadd.s32 1, %s1082_s27   ;;  %s1611_s9 = sld [smem:[#allocation20_spill]] }
 0x1bb   : > { %p1492_p7 = scmp.ge.s32.totalorder %s22_s27, 20   ;;  %s1612_s23 = sld [smem:[#allocation15_spill]] }
 0x1bc   : > { %s1613_s29 = sld [smem:[#allocation16_spill]]  ;;  %s1614_s4 = sld [smem:[#allocation17_spill]] }
 0x1bd   : > { %s1615_s26 = sld [smem:[#allocation19_spill]]  ;;  %s1616_s12 = smov %s1026_s13 }
 0x1be   : > { %s1617_s13 = smov %s1030_s14  ;;  %s1618_s14 = smov %s1338_s7 }
 0x1bf   : > { %s1619_s15 = smov %s1038_s16  ;;  %s1620_s16 = smov %s1042_s17 }
 0x1c0   : > { %s1621_s17 = smov %s1611_s9  ;;  %s1622_s18 = smov %s1050_s19 }
 0x1c1   : > { %s1623_s19 = smov %s1054_s20  ;;  %s1624_s20 = smov %s1335_s28 }
 0x1c2   : > { %s1625_s21 = smov %s1070_s24  ;;  %s1626_s22 = smov %s1074_s25 }
 0x1c3   : > { %s1627_s24 = smov %s1613_s29  ;;  %s1628_s25 = smov %s1614_s4 }
 0x1c4   :  { %21 = sbr.rel (!%p1492_p7) target bundleno = 17 (0x11), region = 101 }
 0x1cb   :  { %460 = vsyncpa [#allocation4], 1 }
 0x1cc   :  { %462 = vsyncpa [#allocation4 + $0x1], 1 }
 0x1cd   :  { %463 = vsyncpa [#allocation7], 1 }
 0x1ce   :  { %465 = vsyncpa [#allocation7 + $0x1], 1 }
 0x1cf   :  { %466 = vsyncpa [#allocation5], 1 }
 0x1d0   :  { %468 = vsyncpa [#allocation5 + $0x1], 1 }

</bundles_post_ra>
